<compile_context>
chip_gen: v5e
topology: v5e:2x2
jax: 0.10.0
libtpu: 0.0.40
codegen_flags: <defaults>
</compile_context>

<pallas_src>
import jax
import jax.numpy as jnp
from jax import lax
from jax.experimental import pallas as pl
from jax.experimental.pallas import tpu as pltpu


def _proj_matmul_kernel(w_ref, col_ref, o_ref):
    # w_ref:   (Cout, 9*Cin)   bf16  (same tile for every grid step)
    # col_ref: (1, 9*Cin, tm)  bf16  (im2col columns for this (image, M-tile))
    # o_ref:   (1, Cout, tm)         lane-dense output tile
    o_ref[0] = jnp.dot(
        w_ref[...], col_ref[0],
        preferred_element_type=jnp.float32,
    ).astype(o_ref.dtype)


def _pick_m_tile(M):
    # Largest lane-dense tile (multiple of 128) that divides the spatial size.
    for cand in (4096, 2048, 1024, 512, 256, 128):
        if M % cand == 0:
            return cand
    return M  # odd spatial sizes: single full block (still a valid BlockSpec)


def overlap_patch_embed(x_nchw, weight_oihw):
    """Forward of OverlapPatchEmbed (Conv2d 3x3, stride 1, pad 1, bias=False).

    x_nchw:      (N, Cin, H, W)    -- PyTorch layout, kept end-to-end
    weight_oihw: (Cout, Cin, 3, 3) -- PyTorch Conv2d weight layout
    returns:     (N, Cout, H, W)
    """
    N, Cin, H, W = x_nchw.shape
    Cout = weight_oihw.shape[0]
    M = H * W
    tm = _pick_m_tile(M)

    # --- wrapper-side im2col (pad fused with patch extraction by XLA) ------
    x_pad = jnp.pad(x_nchw, ((0, 0), (0, 0), (1, 1), (1, 1)))
    patches = [x_pad[:, :, kh:kh + H, kw:kw + W]        # (N, Cin, H, W) each
               for kh in range(3) for kw in range(3)]
    col = jnp.concatenate(patches, axis=1)              # (N, 9*Cin, H, W)
    col = col.reshape(N, 9 * Cin, M).astype(jnp.bfloat16)

    # (Cout, Cin, 3, 3) -> (Cout, 3, 3, Cin) -> (Cout, 9*Cin); row order
    # (kh*3 + kw)*Cin + cin matches the im2col row order above.
    w = jnp.transpose(weight_oihw, (0, 2, 3, 1)).reshape(Cout, 9 * Cin)
    w = w.astype(jnp.bfloat16)

    out = pl.pallas_call(
        _proj_matmul_kernel,
        out_shape=jax.ShapeDtypeStruct((N, Cout, M), x_nchw.dtype),
        grid_spec=pltpu.PrefetchScalarGridSpec(
            num_scalar_prefetch=0,
            grid=(N, M // tm),
            in_specs=[
                pl.BlockSpec((Cout, 9 * Cin), lambda n, m: (0, 0)),
                pl.BlockSpec((1, 9 * Cin, tm), lambda n, m: (n, 0, m)),
            ],
            out_specs=pl.BlockSpec((1, Cout, tm), lambda n, m: (n, 0, m)),
        ),
        compiler_params=pltpu.CompilerParams(
            dimension_semantics=("parallel", "parallel")),
    )(w, col)

    return out.reshape(N, Cout, H, W)  # free metadata reshape (row-major)


if __name__ == "__main__":
    key = jax.random.PRNGKey(0)
    kx, kw = jax.random.split(key)

    # Small shapes consistent with the module: in_c=3, embed_dim=48.
    N, Cin, H, W = 2, 3, 16, 16
    Cout = 48

    x = jax.random.normal(kx, (N, Cin, H, W), dtype=jnp.float32)
    # Deterministic synthetic weights (Conv2d, bias=False), PyTorch OIHW layout.
    weight = jax.random.normal(kw, (Cout, Cin, 3, 3), dtype=jnp.float32) * 0.1

    out = overlap_patch_embed(x, weight)
    out = jax.block_until_ready(out)

    # Sanity check against XLA's native conv (same semantics as nn.Conv2d).
    ref = lax.conv_general_dilated(
        x, weight, window_strides=(1, 1), padding=((1, 1), (1, 1)),
        dimension_numbers=("NCHW", "OIHW", "NCHW"))
    assert out.shape == (N, Cout, H, W)
    # bf16 MXU operands with f32 accumulation -> loosened tolerance vs f32 ref.
    max_err = float(jnp.max(jnp.abs(out - ref)))
    assert jnp.allclose(out, ref, atol=5e-2, rtol=5e-2), max_err

    print("KERNEL_OK")
</pallas_src>

<mosaic_0001>
module attributes {stable_mosaic.version = 11 : i64} {
  func.func @_proj_matmul_kernel(%arg0: i32, %arg1: i32, %arg2: memref<48x27xbf16, #tpu.memory_space<vmem>>, %arg3: memref<1x27x256xbf16, #tpu.memory_space<vmem>>, %arg4: memref<1x48x256xf32, #tpu.memory_space<vmem>>) attributes {dimension_semantics = [#tpu.dimension_semantics<parallel>, #tpu.dimension_semantics<parallel>], iteration_bounds = array<i64: 2, 1>, scalar_prefetch = 0 : i64, scratch_operands = 0 : i64, tpu.core_type = #tpu.core_type<tc>, window_params = [{pipeline_mode = #tpu.pipeline_mode<synchronous>, transform_indices = @transform_0, window_bounds = array<i64: 48, 27>}, {transform_indices = @transform_1, window_bounds = array<i64: 1, 27, 256>}, {transform_indices = @transform_2, window_bounds = array<i64: 1, 48, 256>}]} {
    %c0 = arith.constant 0 : index
    %c0_0 = arith.constant 0 : index
    %0 = vector.load %arg2[%c0, %c0_0] : memref<48x27xbf16, #tpu.memory_space<vmem>>, vector<48x27xbf16>
    %c0_1 = arith.constant 0 : index
    %c0_2 = arith.constant 0 : index
    %c0_3 = arith.constant 0 : index
    %1 = vector.load %arg3[%c0_1, %c0_2, %c0_3] : memref<1x27x256xbf16, #tpu.memory_space<vmem>>, vector<1x27x256xbf16>
    %2 = vector.shape_cast %1 : vector<1x27x256xbf16> to vector<27x256xbf16>
    %cst = arith.constant dense<0.000000e+00> : vector<48x256xf32>
    %3 = tpu.matmul %0, %2, %cst {dimension_numbers = #tpu.dot_dimension_numbers<[1], [0], [0], [1], [0, 0, 1, 1], [], []>} : vector<48x27xbf16>, vector<27x256xbf16>, vector<48x256xf32> -> vector<48x256xf32>
    %c0_4 = arith.constant 0 : index
    %c0_5 = arith.constant 0 : index
    %c0_6 = arith.constant 0 : index
    %4 = vector.load %arg4[%c0_4, %c0_5, %c0_6] : memref<1x48x256xf32, #tpu.memory_space<vmem>>, vector<1x48x256xf32>
    %5 = vector.shape_cast %4 : vector<1x48x256xf32> to vector<48x256xf32>
    %6 = vector.shape_cast %3 : vector<48x256xf32> to vector<1x48x256xf32>
    tpu.vector_store %arg4[%c0_4, %c0_5, %c0_6], %6 {strides = array<i32>} : memref<1x48x256xf32, #tpu.memory_space<vmem>>, vector<1x48x256xf32>,
    return
  }
  func.func @transform_0(%arg0: i32, %arg1: i32) -> (i32, i32) {
    %c0_i32 = arith.constant 0 : i32
    %c0_i32_0 = arith.constant 0 : i32
    %c0_i32_1 = arith.constant 0 : i32
    return %c0_i32, %c0_i32_0 : i32, i32
  }
  func.func @transform_1(%arg0: i32, %arg1: i32) -> (i32, i32, i32) {
    %c0_i32 = arith.constant 0 : i32
    %c0_i32_0 = arith.constant 0 : i32
    return %arg0, %c0_i32, %arg1 : i32, i32, i32
  }
  func.func @transform_2(%arg0: i32, %arg1: i32) -> (i32, i32, i32) {
    %c0_i32 = arith.constant 0 : i32
    %c0_i32_0 = arith.constant 0 : i32
    return %arg0, %c0_i32, %arg1 : i32, i32, i32
  }
}

</mosaic_0001>

<bundles_post_ra>
// kernel: tpu_custom_call.1
= control target key start
LH: loop header
LB: loop body
LE: loop exit
PB: predicated region body
PF: predicated region fallthrough
CT: control target
= control target key end

     0   :  { %7 = vsyncpa [#allocation3], 0  ;;  %s718_s0 = inlined_call_operand.vmem [shape: bf16[48,27], index: 0, kind: input, shape index: {}]   ;;  %s719_s1 = inlined_call_operand.vmem [shape: bf16[2,27,256], index: 1, kind: input, shape index: {}]   ;;  %s720_s2 = inlined_call_operand.hbm [shape: f32[2,48,256], index: 2, kind: output, shape index: {}]  }
   0x1   :  { %9 = vsyncpa [#allocation3 + $0x1], 0  ;;  %s608_s9 = smov 0   ;;  %s610_s10 = smov 0  }
   0x2   :  { %s612_s11 = smov 0   ;;  %s614_s12 = smov 0  }
   0x3   :  { %s616_s13 = smov 0   ;;  %s618_s14 = smov 0  }
   0x4 LB: > { %s394_s15 = sadd.s32 4294967295, %s588_s14   ;;  %s395_s16 = sadd.s32 4294967294, %s588_s14   ;;  %s588_s14 = sphi %s618_s14, %s15_s14   ;;  %s584_s13 = sphi %s616_s13, %s727_s13   ;;  %s580_s12 = sphi %s614_s12, %s726_s12   ;;  %s576_s11 = sphi %s612_s11, %s725_s11   ;;  %s572_s10 = sphi %s610_s10, %s724_s10   ;;  %s568_s9 = sphi %s608_s9, %s723_s9  }
   0x5   : > { %s27_s17 = sadd.s32 1, %s584_s13  ;;  %s85_s18 = sadd.s32 1, %s576_s11 }
   0x6   : > { %p29_p0 = scmp.ge.s32.totalorder %s27_s17, 2  ;;  %p95_p1 = scmp.ne.s32.totalorder %s576_s11, %s572_s10 }
   0x7   : > { %p96_p2 = scmp.eq.s32.totalorder %s394_s15, 1  ;;  %p101_p3 = scmp.ne.s32.totalorder %s572_s10, %s568_s9 }
   0x8   : > { %s729_s17 = smov (%p29_p0, %s27_s17), 0  ;;  %p102_p5 = scmp.eq.s32.totalorder %s395_s16, 1 }
   0x9   : > { %p648_p4 = por %p96_p2, %p95_p1  ;;  %s80_s20 = ssub.s32 %s584_s13, %s729_s17 }
   0xa   : > { %p398_p6 = scmp.ge.s32.totalorder %s588_s14, 1  ;;  %p83_p7 = scmp.eq.s32.totalorder %s80_s20, 0 }
   0xb   : > { %p655_p8 = por %p102_p5, %p101_p3  ;;  %p136_p9 = scmp.lt.s32.totalorder %s588_s14, 3 }
   0xc   : > { %s661_s22 = scalar_select %p83_p7, %s576_s11, %s85_s18  }
   0xd   : > { %p137_p10 = pnand %p398_p6, %p136_p9 }
   0xe   : > { %p163_p11 = scmp.lt.s32.totalorder (!%p137_p10), %s580_s12, 1  ;;  %s159_s6 = sand.u32 (!%p137_p10), 1, %s572_s10  }
   0xf   : > { %140 = sbr.rel (%p137_p10) target bundleno = 197 (0xc5), region = 28  ;;  %s298_s25 = scalar_lea.sflag (!%p137_p10), [#allocation3], %s159_s6 }
  0x10   : > { %s450_s7 = smul.u32 (!%p137_p10), 96, %s159_s6  ;;  %s530_s29 = scalar_lea.hbm (!%p137_p10), %s720_s2, 192 }
  0x11   : > { %s451_s15 = smul.u32 (!%p137_p10), 96, %s580_s12 }
  0x12   : > { %s161_s8 = scalar_lea.vmem (!%p137_p10), [#allocation2], %s450_s7 }
  0x13   : > { %s311_s20 = scalar_lea.hbm (!%p137_p10), %s720_s2, %s451_s15 }
  0x14   : > { %vm227_vm0 = vcmask 1044480   ;;  %s164_s23 = scalar_select %p163_p11, %s580_s12, 1  ;;  %vm228_vm1 = vcmask 1045504   ;;  %v590_v0 = vmov 65535   ;;  %v440_v17 = vld [vmem:[%s718_s0 + $0x8] sm:$0xff]  ;;  %v439_v18 = vld [vmem:[%s718_s0] sm:$0xff] }
  0x15   : > { %v229_v1 = vsel %vm227_vm0, 4294967295, %v590_v0  ;;  %vm217_vm2 = vcmask 220160   ;;  %v441_v19 = vld [vmem:[%s718_s0 + $0x10] sm:$0xff] }
  0x16   : > { %s438_s24 = sshll.u32 %s164_s23, 5  ;;  %v230_v2 = vsel %vm228_vm1, %v229_v1, 0  ;;  %s312_s23 = sshll.u32 %s161_s8, 4  ;;  %s313_s23 = int_to_ptr.vmem [resolvable:$true] %s312_s23 }
  0x17   : > { %s170_s27 = scalar_lea.vmem %s719_s1, %s438_s24  ;;  %s314_s24 = sshll.u32 %s311_s20, 4  ;;  %s315_s24 = int_to_ptr.hbm [resolvable:$true] %s314_s24 }
  0x18   : > { %v423_v3 = vld [vmem:[%s170_s27 + $0x10] sm:$0xf]  ;;  %v445_v4 = vld [vmem:[%s170_s27 + $0x14] sm:$0x30]  ;;  %v444_v5 = vld [vmem:[%s170_s27 + $0x14] sm:$0xf] }
  0x19   : > { %v424_v6 = vor.u32 %v445_v4, %v423_v3  ;;  %v425_v7 = vld [vmem:[%s170_s27 + $0x18] sm:$0x30]  ;;  %v415_v9 = vld [vmem:[%s170_s27] sm:$0xf]  ;;  %v443_v10 = vld [vmem:[%s170_s27 + $0x4] sm:$0xf0] }
  0x1a   : > { %v428_v8 = vor.u32 %v444_v5, %v425_v7  ;;  %v442_v12 = vld [vmem:[%s170_s27 + $0x4] sm:$0xf]  ;;  %v417_v13 = vld [vmem:[%s170_s27 + $0x8] sm:$0xf0]  ;;  %v416_v15 = vor.u32 %v443_v10, %v415_v9  ;;  %s524_s12 = sshra.s32 %s315_s24, 4  ;;  %s525_s12 = int_to_ptr.hbm [resolvable:$true] %s524_s12 }
  0x1b   : > { %v232_v11 = vand.u32 %v424_v6, %v230_v2  ;;  %v420_v16 = vor.u32 %v442_v12, %v417_v13  ;;  %s526_s26 = scalar_lea.hbm %s525_s12, 96  ;;  %p531_p1 = scmp.lt.s32.totalorder %s525_s12, %s720_s2 }
  0x1c   : > { %v235_v14 = vand.u32 %v428_v8, %v230_v2  ;;  %p527_p12 = scmp.ne.s32.totalorder %s525_s12, %s526_s26  ;;  %p532_p2 = scmp.lt.s32.totalorder %s530_s29, %s526_s26 }
  0x1d   : > { %446 = vmatpush.bf16.msra.mxu2 %v232_v11  ;;  %243 = vmatpush.bf16.msra.mxu0 %v232_v11 }
  0x1e   : > { %448 = vmatpush.bf16.msra.mxu3 %v235_v14  ;;  %267 = vmatpush.bf16.msra.mxu1 %v235_v14  ;;  %p528_p13 = pnand %p527_p12, %p648_p4  ;;  %p533_p3 = por %p532_p2, %p531_p1 }
  0x20   : > { %p529_p0 = pneg %p528_p13 }
  0x21   : > { %447 = vmatpush.bf16.msra.mxu2 %v416_v15  ;;  %244 = vmatpush.bf16.msra.mxu0 %v416_v15 }
  0x22   : > { %449 = vmatpush.bf16.msra.mxu3 %v420_v16  ;;  %268 = vmatpush.bf16.msra.mxu1 %v420_v16  ;;  %p534_p5 = pnand %p533_p3, %p529_p0 }
  0x24   : > { %430 = vmatmul.msk.bf16.vlgmr.msra.gmra.mxu2 %vm217_vm2, %v440_v17  ;;  %429 = vmatmul.msk.bf16.vlgmr.msra.gmra.mxu0 %vm217_vm2, %v439_v18 }
  0x25   : > { %433 = vmatmul.msk.bf16.vlgmr.msra.gmra.mxu3 %vm217_vm2, %v440_v17  ;;  %432 = vmatmul.msk.bf16.vlgmr.msra.gmra.mxu1 %vm217_vm2, %v439_v18 }
  0x34   : > { %431 = vmatmul.msk.bf16.gmra.mxu2 %vm217_vm2, %v441_v19 }
  0x35   : > { %434 = vmatmul.msk.bf16.gmra.mxu3 %vm217_vm2, %v441_v19 }
  0xa1   : > { %v246_v20 = vpop.f32.mrf.mxu0 }
  0xa2   : > { %285 = vst [vmem:[%s161_s8] sm:$0xff] %v246_v20  ;;  %v270_v21 = vpop.f32.mrf.mxu1 }
  0xa3   : > { %286 = vst [vmem:[%s161_s8 + $0x8] sm:$0xff] %v270_v21 }
  0xa7   : > { %v251_v22 = vpop.f32.mrf.mxu2 }
  0xa8   : > { %289 = vst [vmem:[%s161_s8 + $0x20] sm:$0xff] %v251_v22  ;;  %v275_v23 = vpop.f32.mrf.mxu3 }
  0xa9   : > { %290 = vst [vmem:[%s161_s8 + $0x28] sm:$0xff] %v275_v23  ;;  %v248_v24 = vpop.f32.mrf.mxu0 }
  0xaa   : > { %287 = vst [vmem:[%s161_s8 + $0x10] sm:$0xff] %v248_v24  ;;  %v272_v25 = vpop.f32.mrf.mxu1 }
  0xab   : > { %288 = vst [vmem:[%s161_s8 + $0x18] sm:$0xff] %v272_v25 }
  0xaf   : > { %v253_v26 = vpop.f32.mrf.mxu2 }
  0xb0   : > { %291 = vst [vmem:[%s161_s8 + $0x30] sm:$0xff] %v253_v26  ;;  %v277_v27 = vpop.f32.mrf.mxu3 }
  0xb1   : > { %292 = vst [vmem:[%s161_s8 + $0x38] sm:$0xff] %v277_v27 }
  0xb7   : > { %v256_v28 = vpop.f32.mrf.mxu2 }
  0xb8   : > { %293 = vst [vmem:[%s161_s8 + $0x40] sm:$0xff] %v256_v28  ;;  %v280_v29 = vpop.f32.mrf.mxu3 }
  0xb9   : > { %294 = vst [vmem:[%s161_s8 + $0x48] sm:$0xff] %v280_v29 }
  0xbf   : > { %v258_v30 = vpop.f32.mrf.mxu2 }
  0xc0   : > { %295 = vst [vmem:[%s161_s8 + $0x50] sm:$0xff] %v258_v30  ;;  %v282_v31 = vpop.f32.mrf.mxu3 }
  0xc1   : > { %296 = vst [vmem:[%s161_s8 + $0x58] sm:$0xff] %v282_v31 }
  0xc2   : > { %537 = shalt.err (!%p534_p5)
}
  0xc3   : > { %s591_s4 = smov 256   ;;  %s592_s5 = smov 16  }
  0xc4   : > { %452 = dma.vmem_to_hbm [thread:$0]  (%p648_p4), %s313_s23, 1536, %s315_s24, %s298_s25, %s591_s4, %s591_s4, %s592_s5  }
  0xc5 PF: > { %p458_p6 = scmp.ge.s32.totalorder %s588_s14, 2  ;;  %s329_s6 = sand.u32 1, %s568_s9  }
  0xc6   : > { %s330_s7 = scalar_lea.sflag [#allocation3], %s329_s6 }
  0xc7   : > { %p455_p7 = pnand %p458_p6, %p655_p8 }
  0xc9   : > { %p456_p9 = pneg %p455_p7 }
  0xcb   : > { %563 = dma.done.wait (%p456_p9), %s330_s7, 1536  }
  0xcc   : > { %565 = vsyncadd (%p456_p9), %s330_s7, 4294965760  ;;  %s15_s14 = sadd.s32 1, %s588_s14   ;;  %s723_s9 = smov %s572_s10 }
  0xcd   : > { %p12_p10 = scmp.ge.s32.totalorder %s15_s14, 4   ;;  %s724_s10 = smov %s576_s11 }
  0xce   : > { %s725_s11 = smov %s661_s22  ;;  %s726_s12 = smov %s584_s13 }
  0xcf   : > { %s727_s13 = smov %s729_s17  ;;  %14 = sbr.rel (!%p12_p10) target bundleno = 4 (0x4), region = 63 }
  0xd4   :  { %336 = vsyncpa [#allocation3], 1 }
  0xd5   :  { %338 = vsyncpa [#allocation3 + $0x1], 1 }

</bundles_post_ra>
